<compile_context>
chip_gen: v5e
topology: v5e:2x2
jax: 0.10.0
libtpu: 0.0.40
codegen_flags: <defaults>
</compile_context>

<pallas_src>
import functools

import jax
import jax.numpy as jnp
import numpy as np
from jax import lax
from jax.experimental import pallas as pl
from jax.experimental.pallas import tpu as pltpu


_TILES = (512, 256, 128, 64, 32, 16, 8)
_VMEM_BUDGET = 44 << 20          # conservative: v7x has 64 MiB physical VMEM


def _choose_tiling(batch: int):
    """Square tile t and padded batch bp (t | bp, bp >= batch, 8 | bp).

    Prefers the largest tile <= 512 that keeps >= 2 row tiles so the
    "parallel" grid axis can split across v7x's two TensorCores; tiny
    batches fall back to a single tile.
    """
    for t in _TILES:
        if 2 * t <= batch:
            return t, -(-batch // t) * t
    t = _TILES[-1]
    return t, -(-batch // t) * t


def _vmem_need(t, bp, d, dp, in_bytes, mxu_bytes, aug_resident):
    """Rough per-core VMEM working set (assumes double-buffered inputs)."""
    orig_in = 2 * t * d * in_bytes
    aug_in = (2 * bp * d * in_bytes) if aug_resident else (2 * t * d * in_bytes)
    scratch = t * d * mxu_bytes + 3 * t * 4 + 8 * t * t   # on_sc + (t,1)x3 + sim slack
    outs = 2 * (8 * 128 + 8 * dp) * 4
    return orig_in + aug_in + scratch + outs


def _infonce_kernel(orig_ref, aug_ref, metrics_ref, s_ref,
                    on_sc, m_sc, l_sc, diag_sc,
                    *, inv_temp, mxu_dtype, tile, batch, padded, aug_resident):
    """One (row tile i, aug column tile j) grid step of the InfoNCE forward."""
    i = pl.program_id(0)            # orig row tile   ("parallel")
    j = pl.program_id(1)            # aug column tile ("arbitrary", innermost)
    t = tile
    d = orig_ref.shape[1]
    dp = s_ref.shape[1]
    ncol = padded // tile
    has_pad = padded != batch       # static python bool

    # ---- per-row-tile init: normalize orig once, reset the online softmax,
    #      and emit the diversity partials from the f32 normalized tile so the
    #      (possibly bf16) on_sc cache never feeds the diversity statistics. ----
    @pl.when(j == 0)
    def _():
        o = orig_ref[...].astype(jnp.float32)
        ssq = jnp.sum(o * o, axis=1, keepdims=True)
        # F.normalize(p=2, dim=1, eps=1e-12) on sum-of-squares: rsqrt on EUP.
        on_f32 = o * lax.rsqrt(jnp.maximum(ssq, 1e-24))
        on_sc[...] = on_f32.astype(mxu_dtype)
        m_sc[...] = jnp.full(m_sc.shape, -jnp.inf, jnp.float32)
        l_sc[...] = jnp.zeros(l_sc.shape, jnp.float32)
        diag_sc[...] = jnp.zeros(diag_sc.shape, jnp.float32)
        # Diversity partials (padded rows are all-zero -> contribute nothing).
        dsq_p = jnp.sum(on_f32 * on_f32)                   # sum_i ||o_i||^2
        s_row = jnp.sum(on_f32, axis=0, keepdims=True)     # (1, d) column sums
        if dp > d:
            s_ref[...] = jnp.zeros(s_ref.shape, jnp.float32)
            s_ref[:, :d] = jnp.broadcast_to(s_row, (s_ref.shape[0], d))
        else:
            s_ref[...] = jnp.broadcast_to(s_row, s_ref.shape)
        lane = lax.broadcasted_iota(jnp.int32, metrics_ref.shape, 1)
        metrics_ref[...] = jnp.where(lane == 2, dsq_p, 0.0)   # stash dsq in lane 2

    # ---- this aug column tile: slice from the VMEM-resident half (one HBM
    #      read total) or read the streamed tile, then L2-normalize it. ----
    if aug_resident and ncol > 1:
        off = pl.multiple_of(j * t, t)
        a = aug_ref[pl.ds(off, t), :].astype(jnp.float32)
    else:
        a = aug_ref[...].astype(jnp.float32)
    asq = jnp.sum(a * a, axis=1, keepdims=True)
    an = (a * lax.rsqrt(jnp.maximum(asq, 1e-24))).astype(mxu_dtype)

    # ---- similarity tile on the MXU; contract last dims (no transpose copy) ----
    sim = lax.dot_general(
        on_sc[...], an,
        dimension_numbers=(((1,), (1,)), ((), ())),
        preferred_element_type=jnp.float32) * inv_temp           # (t, t)
    if has_pad:
        col = j * t + lax.broadcasted_iota(jnp.int32, sim.shape, 1)
        sim = jnp.where(col < batch, sim, -jnp.inf)     # mask padded aug columns

    # ---- online logsumexp across column tiles ----
    m_prev = m_sc[...]
    m_new = jnp.maximum(m_prev, jnp.max(sim, axis=1, keepdims=True))
    l_sc[...] = (jnp.exp(m_prev - m_new) * l_sc[...]
                 + jnp.sum(jnp.exp(sim - m_new), axis=1, keepdims=True))
    m_sc[...] = m_new

    # ---- positive (diagonal) logits live in the matching (j == i) tile only;
    #      taken from `sim` itself so diag >= rowmax is bit-exact vs the MXU. ----
    @pl.when(j == i)
    def _():
        r = lax.broadcasted_iota(jnp.int32, sim.shape, 0)
        c = lax.broadcasted_iota(jnp.int32, sim.shape, 1)
        diag_sc[...] = jnp.sum(jnp.where(r == c, sim, 0.0), axis=1, keepdims=True)

    # ---- finalize this row tile: write loss / accuracy partials ----
    @pl.when(j == ncol - 1)
    def _():
        diag = diag_sc[...]
        lse = m_sc[...] + jnp.log(l_sc[...])
        ce = lse - diag
        # argmax(sim, 1) == label  <=>  diagonal element is the row max.
        # (Exact float ties with an earlier column count as correct here.)
        hit = (diag >= m_sc[...]).astype(jnp.float32)
        if has_pad:
            row = i * t + lax.broadcasted_iota(jnp.int32, ce.shape, 0)
            valid = row < batch
            ce = jnp.where(valid, ce, 0.0)
            hit = jnp.where(valid, hit, 0.0)
        loss_p = jnp.sum(ce)
        acc_p = jnp.sum(hit)
        lane = lax.broadcasted_iota(jnp.int32, metrics_ref.shape, 1)
        prev = metrics_ref[...]                    # lane 2 still holds dsq (j == 0)
        metrics_ref[...] = jnp.where(lane == 0, loss_p,
                                     jnp.where(lane == 1, acc_p, prev))


@functools.partial(jax.jit, static_argnames=("temperature",))
def infonce_loss(embeddings: jax.Array, temperature: float = 0.1):
    """Pallas TPU implementation of InfoNCELoss.forward."""
    batch = embeddings.shape[0] // 2
    if batch <= 0:
        return {"loss": jnp.float32(0.0)}
    d = embeddings.shape[1]
    dp = -(-d // 128) * 128                       # lane-dense column-sum output width
    t, bp = _choose_tiling(batch)
    in_bytes = jnp.dtype(embeddings.dtype).itemsize
    # Keep MXU operands bf16 when activations arrive in bf16 (f32 accumulation).
    mxu_dtype = jnp.bfloat16 if embeddings.dtype == jnp.bfloat16 else jnp.float32
    mxu_bytes = jnp.dtype(mxu_dtype).itemsize

    # Shrink the tile if even the streaming working set would blow the budget.
    while (t > 8 and bp % (t // 2) == 0
           and _vmem_need(t, bp, d, dp, in_bytes, mxu_bytes, False) > _VMEM_BUDGET):
        t //= 2
    # Keep the whole aug half VMEM-resident (single HBM read) when it fits.
    aug_resident = _vmem_need(t, bp, d, dp, in_bytes, mxu_bytes, True) <= _VMEM_BUDGET
    nrow = bp // t
    need = _vmem_need(t, bp, d, dp, in_bytes, mxu_bytes, aug_resident)
    vmem_limit = int(max(min(need + need // 4 + (2 << 20), 64 << 20), 32 << 20))

    # Pad each half to bp rows (multiple of the tile and of 8); padded rows and
    # columns are masked inside the kernel, so arbitrary batch sizes are safe.
    if bp == batch:
        emb = embeddings if embeddings.shape[0] == 2 * batch else embeddings[:2 * batch]
    else:
        pad = ((0, bp - batch), (0, 0))
        emb = jnp.concatenate([jnp.pad(embeddings[:batch], pad),
                               jnp.pad(embeddings[batch:2 * batch], pad)], axis=0)

    kernel = functools.partial(
        _infonce_kernel, inv_temp=float(1.0 / temperature), mxu_dtype=mxu_dtype,
        tile=t, batch=batch, padded=bp, aug_resident=aug_resident)

    if aug_resident:
        # Whole aug half as one constant-index block -> DMA'd from HBM exactly once.
        aug_spec = pl.BlockSpec((bp, d), lambda i, j: (1, 0))
    else:
        # Streaming fallback (aug re-streamed once per row tile).
        aug_spec = pl.BlockSpec((t, d), lambda i, j: (nrow + j, 0))

    metrics, s_part = pl.pallas_call(
        kernel,
        out_shape=(
            jax.ShapeDtypeStruct((nrow * 8, 128), jnp.float32),  # loss/acc/dsq partials
            jax.ShapeDtypeStruct((nrow * 8, dp), jnp.float32),   # per-tile column sums
        ),
        grid_spec=pltpu.PrefetchScalarGridSpec(
            num_scalar_prefetch=0,
            grid=(nrow, nrow),
            in_specs=[
                # Same HBM buffer passed twice; index_maps pick orig / aug halves.
                pl.BlockSpec((t, d), lambda i, j: (i, 0)),
                aug_spec,
            ],
            out_specs=(
                pl.BlockSpec((8, 128), lambda i, j: (i, 0)),
                pl.BlockSpec((8, dp), lambda i, j: (i, 0)),
            ),
            scratch_shapes=[
                pltpu.VMEM((t, d), mxu_dtype),    # normalized orig tile (MXU dtype)
                pltpu.VMEM((t, 1), jnp.float32),  # running row max
                pltpu.VMEM((t, 1), jnp.float32),  # running sum of exp
                pltpu.VMEM((t, 1), jnp.float32),  # positive (diag) logits
            ],
        ),
        compiler_params=pltpu.CompilerParams(
            # Row tiles are independent -> megacore / v7x 2xTC split; the column
            # axis carries the online softmax -> "arbitrary".
            dimension_semantics=("parallel", "arbitrary"),
            vmem_limit_bytes=vmem_limit),
    )(emb, emb)

    m = metrics.reshape(nrow, 8, 128)
    loss = jnp.sum(m[:, 0, 0]) / batch
    accuracy = jnp.sum(m[:, 0, 1]) / batch
    diag_sq = jnp.sum(m[:, 0, 2])
    s = jnp.sum(s_part.reshape(nrow, 8, dp)[:, 0, :d], axis=0)       # (d,)
    # sum_{i!=j} o_i . o_j = ||sum_i o_i||^2 - sum_i ||o_i||^2
    # (f32; subject to cancellation for very large B vs the explicit o@o.T form)
    off_sum = jnp.dot(s, s) - diag_sq
    diversity = 1.0 - off_sum / float(batch * (batch - 1)) if batch > 1 else jnp.float32(0.0)
    return {"loss": loss,
            "contrastive_accuracy": accuracy,
            "embedding_diversity": diversity}


def _infonce_reference(embeddings, temperature=0.1):
    """Pure-JAX reference matching the PyTorch semantics (for verification)."""
    B = embeddings.shape[0] // 2

    def norm(x):
        n = jnp.sqrt(jnp.sum(x * x, axis=1, keepdims=True))
        return x / jnp.maximum(n, 1e-12)

    o = norm(embeddings[:B].astype(jnp.float32))
    a = norm(embeddings[B:2 * B].astype(jnp.float32))
    sim = (o @ a.T) / temperature
    labels = jnp.arange(B)
    lse = jax.nn.logsumexp(sim, axis=1)
    loss = jnp.mean(lse - sim[labels, labels])
    acc = jnp.mean((jnp.argmax(sim, axis=1) == labels).astype(jnp.float32))
    all_sims = o @ o.T
    mask = ~jnp.eye(B, dtype=bool)
    div = 1.0 - jnp.sum(jnp.where(mask, all_sims, 0.0)) / (B * (B - 1))
    return loss, acc, div


if __name__ == "__main__":
    key = jax.random.PRNGKey(0)
    # 2*B = 16 embeddings of dim 32  (B = 8 original / augmented pairs)
    embeddings = jax.random.normal(key, (16, 32), dtype=jnp.float32)

    out = infonce_loss(embeddings, temperature=0.1)
    out = jax.tree_util.tree_map(jax.block_until_ready, out)

    ref_loss, ref_acc, ref_div = _infonce_reference(embeddings, 0.1)
    assert np.allclose(float(out["loss"]), float(ref_loss), rtol=1e-4, atol=1e-5)
    assert np.allclose(
        float(out["contrastive_accuracy"]), float(ref_acc), rtol=1e-4, atol=1e-5
    )
    assert np.allclose(
        float(out["embedding_diversity"]), float(ref_div), rtol=1e-4, atol=1e-5
    )

    print("KERNEL_OK")
</pallas_src>

<mosaic_0001>
module attributes {stable_mosaic.version = 11 : i64} {
  func.func @_infonce_kernel(%arg0: i32, %arg1: i32, %arg2: memref<8x32xf32, #tpu.memory_space<vmem>>, %arg3: memref<8x32xf32, #tpu.memory_space<vmem>>, %arg4: memref<8x128xf32, #tpu.memory_space<vmem>>, %arg5: memref<8x128xf32, #tpu.memory_space<vmem>>, %arg6: memref<8x32xf32, #tpu.memory_space<vmem>>, %arg7: memref<8x1xf32, #tpu.memory_space<vmem>>, %arg8: memref<8x1xf32, #tpu.memory_space<vmem>>, %arg9: memref<8x1xf32, #tpu.memory_space<vmem>>) attributes {dimension_semantics = [#tpu.dimension_semantics<parallel>, #tpu.dimension_semantics<arbitrary>], iteration_bounds = array<i64: 1, 1>, scalar_prefetch = 0 : i64, scratch_operands = 4 : i64, tpu.core_type = #tpu.core_type<tc>, window_params = [{transform_indices = @transform_0, window_bounds = array<i64: 8, 32>}, {transform_indices = @transform_1, window_bounds = array<i64: 8, 32>}, {transform_indices = @transform_2, window_bounds = array<i64: 8, 128>}, {transform_indices = @transform_3, window_bounds = array<i64: 8, 128>}]} {
    %c0_i32 = arith.constant 0 : i32
    %0 = arith.cmpi eq, %arg1, %c0_i32 : i32
    %1 = arith.extui %0 : i1 to i32
    %c0_i32_0 = arith.constant 0 : i32
    %2 = arith.cmpi ne, %1, %c0_i32_0 : i32
    scf.if %2 {
      %c0_20 = arith.constant 0 : index
      %c0_21 = arith.constant 0 : index
      %38 = vector.load %arg2[%c0_20, %c0_21] : memref<8x32xf32, #tpu.memory_space<vmem>>, vector<8x32xf32>
      %39 = arith.mulf %38, %38 : vector<8x32xf32>
      %cst_22 = arith.constant dense<0.000000e+00> : vector<8xf32>
      %40 = vector.multi_reduction <add>, %39, %cst_22 [1] : vector<8x32xf32> to vector<8xf32>
      %41 = vector.shape_cast %40 : vector<8xf32> to vector<8x1xf32>
      %cst_23 = arith.constant 1.000000e-24 : f32
      %42 = vector.broadcast %cst_23 : f32 to vector<8x1xf32>
      %43 = arith.maximumf %41, %42 : vector<8x1xf32>
      %44 = math.rsqrt %43 : vector<8x1xf32>
      %45 = vector.broadcast %44 : vector<8x1xf32> to vector<8x32xf32>
      %46 = arith.mulf %38, %45 : vector<8x32xf32>
      %c0_24 = arith.constant 0 : index
      %c0_25 = arith.constant 0 : index
      %47 = vector.load %arg6[%c0_24, %c0_25] : memref<8x32xf32, #tpu.memory_space<vmem>>, vector<8x32xf32>
      tpu.vector_store %arg6[%c0_24, %c0_25], %46 {strides = array<i32>} : memref<8x32xf32, #tpu.memory_space<vmem>>, vector<8x32xf32>,
      %cst_26 = arith.constant 0xFF800000 : f32
      %48 = vector.broadcast %cst_26 : f32 to vector<8x1xf32>
      %c0_27 = arith.constant 0 : index
      %c0_28 = arith.constant 0 : index
      %49 = vector.load %arg7[%c0_27, %c0_28] : memref<8x1xf32, #tpu.memory_space<vmem>>, vector<8x1xf32>
      tpu.vector_store %arg7[%c0_27, %c0_28], %48 {strides = array<i32>} : memref<8x1xf32, #tpu.memory_space<vmem>>, vector<8x1xf32>,
      %cst_29 = arith.constant 0.000000e+00 : f32
      %50 = vector.broadcast %cst_29 : f32 to vector<8x1xf32>
      %c0_30 = arith.constant 0 : index
      %c0_31 = arith.constant 0 : index
      %51 = vector.load %arg8[%c0_30, %c0_31] : memref<8x1xf32, #tpu.memory_space<vmem>>, vector<8x1xf32>
      tpu.vector_store %arg8[%c0_30, %c0_31], %50 {strides = array<i32>} : memref<8x1xf32, #tpu.memory_space<vmem>>, vector<8x1xf32>,
      %cst_32 = arith.constant 0.000000e+00 : f32
      %52 = vector.broadcast %cst_32 : f32 to vector<8x1xf32>
      %c0_33 = arith.constant 0 : index
      %c0_34 = arith.constant 0 : index
      %53 = vector.load %arg9[%c0_33, %c0_34] : memref<8x1xf32, #tpu.memory_space<vmem>>, vector<8x1xf32>
      tpu.vector_store %arg9[%c0_33, %c0_34], %52 {strides = array<i32>} : memref<8x1xf32, #tpu.memory_space<vmem>>, vector<8x1xf32>,
      %54 = arith.mulf %46, %46 : vector<8x32xf32>
      %55 = vector.shape_cast %54 : vector<8x32xf32> to vector<1x8x32xf32>
      %cst_35 = arith.constant dense<0.000000e+00> : vector<1xf32>
      %56 = vector.multi_reduction <add>, %55, %cst_35 [1, 2] : vector<1x8x32xf32> to vector<1xf32>
      %57 = vector.shape_cast %56 : vector<1xf32> to vector<1x1x1xf32>
      %58 = vector.extract %57[0, 0, 0] : f32 from vector<1x1x1xf32>
      %cst_36 = arith.constant dense<0.000000e+00> : vector<32xf32>
      %59 = vector.multi_reduction <add>, %46, %cst_36 [0] : vector<8x32xf32> to vector<32xf32>
      %60 = vector.shape_cast %59 : vector<32xf32> to vector<1x32xf32>
      %cst_37 = arith.constant 0.000000e+00 : f32
      %61 = vector.broadcast %cst_37 : f32 to vector<8x128xf32>
      %c0_38 = arith.constant 0 : index
      %c0_39 = arith.constant 0 : index
      %62 = vector.load %arg5[%c0_38, %c0_39] : memref<8x128xf32, #tpu.memory_space<vmem>>, vector<8x128xf32>
      tpu.vector_store %arg5[%c0_38, %c0_39], %61 {strides = array<i32>} : memref<8x128xf32, #tpu.memory_space<vmem>>, vector<8x128xf32>,
      %63 = vector.shape_cast %60 : vector<1x32xf32> to vector<1x32xf32>
      %64 = vector.broadcast %63 : vector<1x32xf32> to vector<8x32xf32>
      %c0_40 = arith.constant 0 : index
      %c0_41 = arith.constant 0 : index
      %65 = vector.load %arg5[%c0_40, %c0_41] : memref<8x128xf32, #tpu.memory_space<vmem>>, vector<8x32xf32>
      tpu.vector_store %arg5[%c0_40, %c0_41], %64 {strides = array<i32>} : memref<8x128xf32, #tpu.memory_space<vmem>>, vector<8x32xf32>,
      %66 = tpu.iota {dimensions = array<i32: 1>} : vector<8x128xi32>
      %c2_i32 = arith.constant 2 : i32
      %67 = vector.broadcast %c2_i32 : i32 to vector<8x128xi32>
      %68 = arith.cmpi eq, %66, %67 : vector<8x128xi32>
      %cst_42 = arith.constant 0.000000e+00 : f32
      %69 = vector.broadcast %58 : f32 to vector<8x128xf32>
      %70 = vector.broadcast %cst_42 : f32 to vector<8x128xf32>
      %71 = arith.select %68, %69, %70 : vector<8x128xi1>, vector<8x128xf32>
      %c0_43 = arith.constant 0 : index
      %c0_44 = arith.constant 0 : index
      %72 = vector.load %arg4[%c0_43, %c0_44] : memref<8x128xf32, #tpu.memory_space<vmem>>, vector<8x128xf32>
      tpu.vector_store %arg4[%c0_43, %c0_44], %71 {strides = array<i32>} : memref<8x128xf32, #tpu.memory_space<vmem>>, vector<8x128xf32>,
    } else {
    }
    %c0 = arith.constant 0 : index
    %c0_1 = arith.constant 0 : index
    %3 = vector.load %arg3[%c0, %c0_1] : memref<8x32xf32, #tpu.memory_space<vmem>>, vector<8x32xf32>
    %4 = arith.mulf %3, %3 : vector<8x32xf32>
    %cst = arith.constant dense<0.000000e+00> : vector<8xf32>
    %5 = vector.multi_reduction <add>, %4, %cst [1] : vector<8x32xf32> to vector<8xf32>
    %6 = vector.shape_cast %5 : vector<8xf32> to vector<8x1xf32>
    %cst_2 = arith.constant 1.000000e-24 : f32
    %7 = vector.broadcast %cst_2 : f32 to vector<8x1xf32>
    %8 = arith.maximumf %6, %7 : vector<8x1xf32>
    %9 = math.rsqrt %8 : vector<8x1xf32>
    %10 = vector.broadcast %9 : vector<8x1xf32> to vector<8x32xf32>
    %11 = arith.mulf %3, %10 : vector<8x32xf32>
    %c0_3 = arith.constant 0 : index
    %c0_4 = arith.constant 0 : index
    %12 = vector.load %arg6[%c0_3, %c0_4] : memref<8x32xf32, #tpu.memory_space<vmem>>, vector<8x32xf32>
    %cst_5 = arith.constant dense<0.000000e+00> : vector<8x8xf32>
    %13 = tpu.matmul %12, %11, %cst_5 {dimension_numbers = #tpu.dot_dimension_numbers<[1], [1], [0], [0], [0, 0, 1, 0], [], []>} : vector<8x32xf32>, vector<8x32xf32>, vector<8x8xf32> -> vector<8x8xf32>
    %cst_6 = arith.constant 1.000000e+01 : f32
    %14 = vector.broadcast %cst_6 : f32 to vector<8x8xf32>
    %15 = arith.mulf %13, %14 : vector<8x8xf32>
    %c0_7 = arith.constant 0 : index
    %c0_8 = arith.constant 0 : index
    %16 = vector.load %arg7[%c0_7, %c0_8] : memref<8x1xf32, #tpu.memory_space<vmem>>, vector<8x1xf32>
    %cst_9 = arith.constant dense<0xFF800000> : vector<8xf32>
    %17 = vector.multi_reduction <maximumf>, %15, %cst_9 [1] : vector<8x8xf32> to vector<8xf32>
    %18 = vector.shape_cast %17 : vector<8xf32> to vector<8x1xf32>
    %19 = arith.maximumf %16, %18 : vector<8x1xf32>
    %20 = arith.subf %16, %19 : vector<8x1xf32>
    %21 = math.exp %20 : vector<8x1xf32>
    %c0_10 = arith.constant 0 : index
    %c0_11 = arith.constant 0 : index
    %22 = vector.load %arg8[%c0_10, %c0_11] : memref<8x1xf32, #tpu.memory_space<vmem>>, vector<8x1xf32>
    %23 = arith.mulf %21, %22 : vector<8x1xf32>
    %24 = vector.broadcast %19 : vector<8x1xf32> to vector<8x8xf32>
    %25 = arith.subf %15, %24 : vector<8x8xf32>
    %26 = math.exp %25 : vector<8x8xf32>
    %cst_12 = arith.constant dense<0.000000e+00> : vector<8xf32>
    %27 = vector.multi_reduction <add>, %26, %cst_12 [1] : vector<8x8xf32> to vector<8xf32>
    %28 = vector.shape_cast %27 : vector<8xf32> to vector<8x1xf32>
    %29 = arith.addf %23, %28 : vector<8x1xf32>
    %c0_13 = arith.constant 0 : index
    %c0_14 = arith.constant 0 : index
    %30 = vector.load %arg8[%c0_13, %c0_14] : memref<8x1xf32, #tpu.memory_space<vmem>>, vector<8x1xf32>
    tpu.vector_store %arg8[%c0_13, %c0_14], %29 {strides = array<i32>} : memref<8x1xf32, #tpu.memory_space<vmem>>, vector<8x1xf32>,
    %c0_15 = arith.constant 0 : index
    %c0_16 = arith.constant 0 : index
    %31 = vector.load %arg7[%c0_15, %c0_16] : memref<8x1xf32, #tpu.memory_space<vmem>>, vector<8x1xf32>
    tpu.vector_store %arg7[%c0_15, %c0_16], %19 {strides = array<i32>} : memref<8x1xf32, #tpu.memory_space<vmem>>, vector<8x1xf32>,
    %32 = arith.cmpi eq, %arg1, %arg0 : i32
    %33 = arith.extui %32 : i1 to i32
    %c0_i32_17 = arith.constant 0 : i32
    %34 = arith.cmpi ne, %33, %c0_i32_17 : i32
    scf.if %34 {
      %38 = tpu.iota {dimensions = array<i32: 0>} : vector<8x8xi32>
      %39 = tpu.iota {dimensions = array<i32: 1>} : vector<8x8xi32>
      %40 = arith.cmpi eq, %38, %39 : vector<8x8xi32>
      %cst_20 = arith.constant 0.000000e+00 : f32
      %41 = vector.broadcast %cst_20 : f32 to vector<8x8xf32>
      %42 = arith.select %40, %15, %41 : vector<8x8xi1>, vector<8x8xf32>
      %cst_21 = arith.constant dense<0.000000e+00> : vector<8xf32>
      %43 = vector.multi_reduction <add>, %42, %cst_21 [1] : vector<8x8xf32> to vector<8xf32>
      %44 = vector.shape_cast %43 : vector<8xf32> to vector<8x1xf32>
      %c0_22 = arith.constant 0 : index
      %c0_23 = arith.constant 0 : index
      %45 = vector.load %arg9[%c0_22, %c0_23] : memref<8x1xf32, #tpu.memory_space<vmem>>, vector<8x1xf32>
      tpu.vector_store %arg9[%c0_22, %c0_23], %44 {strides = array<i32>} : memref<8x1xf32, #tpu.memory_space<vmem>>, vector<8x1xf32>,
    } else {
    }
    %c0_i32_18 = arith.constant 0 : i32
    %35 = arith.cmpi eq, %arg1, %c0_i32_18 : i32
    %36 = arith.extui %35 : i1 to i32
    %c0_i32_19 = arith.constant 0 : i32
    %37 = arith.cmpi ne, %36, %c0_i32_19 : i32
    scf.if %37 {
      %c0_20 = arith.constant 0 : index
      %c0_21 = arith.constant 0 : index
      %38 = vector.load %arg9[%c0_20, %c0_21] : memref<8x1xf32, #tpu.memory_space<vmem>>, vector<8x1xf32>
      %c0_22 = arith.constant 0 : index
      %c0_23 = arith.constant 0 : index
      %39 = vector.load %arg7[%c0_22, %c0_23] : memref<8x1xf32, #tpu.memory_space<vmem>>, vector<8x1xf32>
      %c0_24 = arith.constant 0 : index
      %c0_25 = arith.constant 0 : index
      %40 = vector.load %arg8[%c0_24, %c0_25] : memref<8x1xf32, #tpu.memory_space<vmem>>, vector<8x1xf32>
      %41 = math.log %40 : vector<8x1xf32>
      %42 = arith.addf %39, %41 : vector<8x1xf32>
      %43 = arith.subf %42, %38 : vector<8x1xf32>
      %c0_26 = arith.constant 0 : index
      %c0_27 = arith.constant 0 : index
      %44 = vector.load %arg7[%c0_26, %c0_27] : memref<8x1xf32, #tpu.memory_space<vmem>>, vector<8x1xf32>
      %45 = arith.cmpf oge, %38, %44 : vector<8x1xf32>
      %46 = arith.extui %45 : vector<8x1xi1> to vector<8x1xi32>
      %47 = arith.sitofp %46 : vector<8x1xi32> to vector<8x1xf32>
      %48 = vector.shape_cast %43 : vector<8x1xf32> to vector<1x8x1xf32>
      %cst_28 = arith.constant dense<0.000000e+00> : vector<1xf32>
      %49 = vector.multi_reduction <add>, %48, %cst_28 [1, 2] : vector<1x8x1xf32> to vector<1xf32>
      %50 = vector.shape_cast %49 : vector<1xf32> to vector<1x1x1xf32>
      %51 = vector.extract %50[0, 0, 0] : f32 from vector<1x1x1xf32>
      %52 = vector.shape_cast %47 : vector<8x1xf32> to vector<1x8x1xf32>
      %cst_29 = arith.constant dense<0.000000e+00> : vector<1xf32>
      %53 = vector.multi_reduction <add>, %52, %cst_29 [1, 2] : vector<1x8x1xf32> to vector<1xf32>
      %54 = vector.shape_cast %53 : vector<1xf32> to vector<1x1x1xf32>
      %55 = vector.extract %54[0, 0, 0] : f32 from vector<1x1x1xf32>
      %56 = tpu.iota {dimensions = array<i32: 1>} : vector<8x128xi32>
      %c0_30 = arith.constant 0 : index
      %c0_31 = arith.constant 0 : index
      %57 = vector.load %arg4[%c0_30, %c0_31] : memref<8x128xf32, #tpu.memory_space<vmem>>, vector<8x128xf32>
      %c0_i32_32 = arith.constant 0 : i32
      %58 = vector.broadcast %c0_i32_32 : i32 to vector<8x128xi32>
      %59 = arith.cmpi eq, %56, %58 : vector<8x128xi32>
      %c1_i32 = arith.constant 1 : i32
      %60 = vector.broadcast %c1_i32 : i32 to vector<8x128xi32>
      %61 = arith.cmpi eq, %56, %60 : vector<8x128xi32>
      %62 = vector.broadcast %55 : f32 to vector<8x128xf32>
      %63 = arith.select %61, %62, %57 : vector<8x128xi1>, vector<8x128xf32>
      %64 = vector.broadcast %51 : f32 to vector<8x128xf32>
      %65 = arith.select %59, %64, %63 : vector<8x128xi1>, vector<8x128xf32>
      %c0_33 = arith.constant 0 : index
      %c0_34 = arith.constant 0 : index
      %66 = vector.load %arg4[%c0_33, %c0_34] : memref<8x128xf32, #tpu.memory_space<vmem>>, vector<8x128xf32>
      tpu.vector_store %arg4[%c0_33, %c0_34], %65 {strides = array<i32>} : memref<8x128xf32, #tpu.memory_space<vmem>>, vector<8x128xf32>,
    } else {
    }
    return
  }
  func.func @transform_0(%arg0: i32, %arg1: i32) -> (i32, i32) {
    %c0_i32 = arith.constant 0 : i32
    %c0_i32_0 = arith.constant 0 : i32
    return %arg0, %c0_i32 : i32, i32
  }
  func.func @transform_1(%arg0: i32, %arg1: i32) -> (i32, i32) {
    %c1_i32 = arith.constant 1 : i32
    %c0_i32 = arith.constant 0 : i32
    %c0_i32_0 = arith.constant 0 : i32
    return %c1_i32, %c0_i32 : i32, i32
  }
  func.func @transform_2(%arg0: i32, %arg1: i32) -> (i32, i32) {
    %c0_i32 = arith.constant 0 : i32
    %c0_i32_0 = arith.constant 0 : i32
    return %arg0, %c0_i32 : i32, i32
  }
  func.func @transform_3(%arg0: i32, %arg1: i32) -> (i32, i32) {
    %c0_i32 = arith.constant 0 : i32
    %c0_i32_0 = arith.constant 0 : i32
    return %arg0, %c0_i32 : i32, i32
  }
}

</mosaic_0001>

<bundles_post_ra>
// kernel: infonce_loss.1
= control target key start
LH: loop header
LB: loop body
LE: loop exit
PB: predicated region body
PF: predicated region fallthrough
CT: control target
= control target key end

     0   :  { %9 = vsyncpa [#allocation7], 0  ;;  %s375_s0 = inlined_call_operand.hbm [shape: f32[16,32], index: 0, kind: input, shape index: {}, may-alias: {0,1}]   ;;  %s376_s1 = inlined_call_operand.hbm [shape: f32[16,32], index: 1, kind: input, shape index: {}, may-alias: {0,1}]   ;;  %s377_s2 = inlined_call_operand.vmem [shape: f32[8,128], index: 2, kind: output, shape index: {0}]   ;;  %s378_s3 = inlined_call_operand.vmem [shape: f32[8,128], index: 3, kind: output, shape index: {1}]  }
   0x1   :  { %s16_s14 = sshll.u32 %s375_s0, 4  ;;  %s17_s14 = int_to_ptr.hbm [resolvable:$true] %s16_s14 }
   0x2   :  { %10 = vsyncpa [#allocation9], 0  ;;  %s312_s15 = smov [#allocation6]   ;;  %s26_s19 = scalar_lea.hbm %s376_s1, 8 }
   0x3   :  { %s18_s16 = sshll.u32 %s312_s15, 4  ;;  %s28_s20 = sshll.u32 %s26_s19, 4  ;;  %s19_s16 = int_to_ptr.vmem [resolvable:$true] %s18_s16  ;;  %s29_s20 = int_to_ptr.hbm [resolvable:$true] %s28_s20 }
   0x4   :  { %21 = dma.hbm_to_vmem [thread:$0]  %s17_s14, 128, %s19_s16, [#allocation7]  }
   0x5   :  { %s313_s21 = smov [#allocation8]  }
   0x6   :  { %s30_s22 = sshll.u32 %s313_s21, 4  ;;  %s31_s22 = int_to_ptr.vmem [resolvable:$true] %s30_s22 }
   0x7   :  { %33 = dma.hbm_to_vmem [thread:$0]  %s29_s20, 128, %s31_s22, [#allocation9]  }
   0x8   :  { %308 = dma.done.wait [#allocation7], 128  }
   0x9   :  { %309 = vsyncadd [#allocation7], 4294967168 }
   0xa   :  { %310 = dma.done.wait [#allocation9], 128  }
   0xb   :  { %311 = vsyncadd [#allocation9], 4294967168  ;;  %v46_v0 = vld [vmem:[#allocation6] sm:$0xff]  ;;  %vm48_vm0 = vcmask 261120   ;;  %v95_v2 = vld [vmem:[#allocation8] sm:$0xff]  ;;  %v314_v8 = vmov 0.0   ;;  %v89_v56 = vlaneseq }
   0xc   :  { %v47_v1 = vmul.f32 %v46_v0, %v46_v0  ;;  %v96_v4 = vmul.f32 %v95_v2, %v95_v2  ;;  %87 = vst [vmem:[%s378_s3] sm:$0xff] %v314_v8  ;;  %vm142_vm7 = vcmask 64512   ;;  %vm65_vm8 = vcmask 7168  }
   0xd   :  { %v315_v47 = vmov -inf   ;;  %67 = vst.msk [vmem:[#allocation4] sm:$0xff] %vm65_vm8, %v314_v8  ;;  %v316_v48 = vmov 0   ;;  %v90_v57 = vand.u32 127, %v89_v56  ;;  %v172_v58 = vshrl.u32 %v89_v56, 7 }
   0xe   :  { %v49_v3 = vsel %vm48_vm0, %v47_v1, 0.0  ;;  %v98_v5 = vsel %vm48_vm0, %v96_v4, 0.0  ;;  %66 = vst.msk [vmem:[#allocation3] sm:$0xff] %vm65_vm8, %v315_v47  ;;  %248 = vset.pattern.permute.xlu1 %v316_v48  ;;  %249 = vset.pattern.permute.xlu0 %v316_v48 }
   0xf   :  { %50 = vadd.xlane.f32.xlu0 %v49_v3  ;;  %68 = vst.msk [vmem:[#allocation5] sm:$0xff] %vm65_vm8, %v314_v8  ;;  %vm175_vm9 = vcmp.eq.s32.totalorder %v172_v58, %v90_v57  ;;  %vm91_vm11 = vcmp.eq.s32.totalorder %v90_v57, 2  ;;  %vm218_vm12 = vcmp.eq.s32.totalorder %v90_v57, 1  ;;  %vm217_vm13 = vcmp.eq.s32.totalorder %v90_v57, 0 }
  0x14   :  { %v150_v1 = vld [vmem:[#allocation4] sm:$0xff] }
  0x15   :  { %v141_v49 = vld [vmem:[#allocation3] sm:$0xff] }
  0x17   :  { %99 = vadd.xlane.f32.xlu0 %v98_v5 }
  0x82   :  { %v51_v6 = vpop.xlane.xlu0 %50 }
  0x83   :  { %v52_v7 = vmax.f32 %v51_v6, 1e-24 }
  0x85   :  { %250 = vrsqrt.f32 %v52_v7  ;;  %vm59_vm2 = vweird.f32 %v52_v7 }
  0x8a   :  { %v100_v9 = vpop.xlane.xlu0 %99 }
  0x8b   :  { %v251_v10 = vpop.eup %250  ;;  %v101_v11 = vmax.f32 %v100_v9, 1e-24 }
  0x8c   :  { %v54_v12 = vmul.f32 %v251_v10, %v52_v7  ;;  %vm60_vm1 = vweird.f32 %v251_v10 }
  0x8d   :  { %252 = vrsqrt.f32 %v101_v11  ;;  %vm61_vm3 = vmor %vm59_vm2, %vm60_vm1  ;;  %vm108_vm5 = vweird.f32 %v101_v11 }
  0x8e   :  { %v55_v13 = vmul.f32 %v251_v10, %v54_v12 }
  0x90   :  { %v56_v14 = vmul.f32 0.5, %v55_v13 }
  0x92   :  { %v57_v15 = vsub.f32 1.5, %v56_v14 }
  0x93   :  { %v253_v16 = vpop.eup %252 }
  0x94   :  { %v58_v17 = vmul.f32 %v251_v10, %v57_v15  ;;  %v103_v18 = vmul.f32 %v253_v16, %v101_v11  ;;  %vm109_vm4 = vweird.f32 %v253_v16 }
  0x95   :  { %vm110_vm6 = vmor %vm108_vm5, %vm109_vm4 }
  0x96   :  { %v104_v19 = vmul.f32 %v253_v16, %v103_v18  ;;  %v62_v20 = vsel %vm61_vm3, %v251_v10, %v58_v17 }
  0x97   :  { %v63_v21 = vmul.f32 %v62_v20, %v46_v0 }
  0x98   :  { %v105_v22 = vmul.f32 0.5, %v104_v19 }
  0x99   :  { %v69_v23 = vmul.f32 %v63_v21, %v63_v21  ;;  %v80_v24 = vsel %vm48_vm0, %v63_v21, 0.0  ;;  %64 = vst.msk [vmem:[#allocation2] sm:$0xff] %vm48_vm0, %v63_v21 }
  0x9a   :  { %v106_v25 = vsub.f32 1.5, %v105_v22  ;;  %v81_v26 = vrot.slane %v80_v24, 4 }
  0x9b   :  { %v70_v27 = vsel %vm48_vm0, %v69_v23, 0.0 }
  0x9c   :  { %v82_v28 = vadd.f32 %v81_v26, %v80_v24  ;;  %71 = vadd.xlane.f32.xlu0 %v70_v27  ;;  %v107_v29 = vmul.f32 %v253_v16, %v106_v25 }
  0x9e   :  { %v83_v30 = vrot.slane %v82_v28, 2  ;;  %v111_v31 = vsel %vm110_vm6, %v253_v16, %v107_v29 }
  0x9f   :  { %v112_v32 = vmul.f32 %v111_v31, %v95_v2 }
  0xa0   :  { %v84_v33 = vadd.f32 %v83_v30, %v82_v28  ;;  %v113_v35 = vld [vmem:[#allocation2] sm:$0xff] }
  0xa1   :  { %234 = vmatpush.xpose.msk.msra.mxu0 %vm48_vm0, %v112_v32 }
  0xa2   :  { %v85_v34 = vrot.slane %v84_v33, 1 }
  0xa4   :  { %v86_v36 = vadd.f32 %v85_v34, %v84_v33  ;;  %235 = vmatmul.msk.f32.vlgmr.msra.gmra.mxu0 %vm48_vm0, %v113_v35 }
  0xa6   :  { %88 = vst.msk [vmem:[%s378_s3] sm:$0xff] %vm48_vm0, %v86_v36 }
 0x10f   :  { %v72_v37 = vpop.xlane.xlu0 %71 }
 0x110   :  { %v73_v38 = vrot.slane %v72_v37, 4 }
 0x112   :  { %v74_v39 = vadd.f32 %v73_v38, %v72_v37 }
 0x114   :  { %v75_v40 = vrot.slane %v74_v39, 2 }
 0x116   :  { %v76_v41 = vadd.f32 %v75_v40, %v74_v39 }
 0x118   :  { %v77_v42 = vrot.slane %v76_v41, 1 }
 0x11a   :  { %v78_v43 = vadd.f32 %v77_v42, %v76_v41 }
 0x11c   :  { %237 = vpush %v78_v43 }
 0x121   :  { %v137_v44 = vpop.f32.mrf.mxu0 }
 0x122   :  { %v140_v45 = vmul.f32 10.0, %v137_v44 }
 0x124   :  { %v143_v46 = vsel %vm142_vm7, %v140_v45, -inf  ;;  %v176_v61 = vsel %vm175_vm9, %v140_v45, 0.0 }
 0x125   :  { %144 = vmax.xlane.f32.xlu1 %v143_v46  ;;  %v177_v62 = vsel %vm142_vm7, %v176_v61, 0.0 }
 0x14d   :  { %s238_s3 = spop %237 }
 0x14e   :  { %v92_v30 = vstv %s238_s3 }
 0x14f   :  { %v93_v32 = vsel %vm91_vm11, %v92_v30, 0.0 }
 0x198   :  { %v145_v50 = vpop.xlane.xlu1 %144 }
 0x199   :  { %v146_v51 = vmax.f32 %v141_v49, %v145_v50 }
 0x19b   :  { %v147_v52 = vsub.f32 %v141_v49, %v146_v51  ;;  %166 = vst.msk [vmem:[#allocation3] sm:$0xff] %vm65_vm8, %v146_v51  ;;  %154 = vperm.xlu1 %248, %v146_v51  }
 0x19d   :  { %v148_v63 = vmul.f32 1.442695, %v147_v52 }
 0x1a2   :  { %v185_v9 = vld [vmem:[#allocation3] sm:$0xff] }
 0x20d   :  { %v155_v53 = vpop.permute.xlu1 %154 }
 0x20e   :  { %v157_v54 = vsub.f32 %v140_v45, %v155_v53 }
 0x210   :  { %v158_v55 = vmul.f32 1.442695, %v157_v54 }
 0x212   :  { %254 = vpow2.f32 %v158_v55 }
 0x213   :  { %256 = vpow2.f32 %v148_v63 }
 0x218   :  { %v255_v59 = vpop.eup %254 }
 0x219   :  { %v160_v60 = vsel %vm142_vm7, %v255_v59, 0.0  ;;  %v257_v0 = vpop.eup %256 }
 0x21a   :  { %161 = vadd.xlane.f32.xlu2 %v160_v60  ;;  %v151_v2 = vmul.f32 %v257_v0, %v150_v1 }
 0x222   :  { %178 = vadd.xlane.f32.xlu2 %v177_v62 }
 0x28d   :  { %v162_v3 = vpop.xlane.xlu2 %161 }
 0x28e   :  { %v163_v4 = vadd.f32 %v162_v3, %v151_v2 }
 0x290   :  { %165 = vst.msk [vmem:[#allocation4] sm:$0xff] %vm65_vm8, %v163_v4 }
 0x295   :  { %v179_v5 = vpop.xlane.xlu2 %178 }
 0x296   :  { %180 = vst.msk [vmem:[#allocation5] sm:$0xff] %vm65_vm8, %v179_v5 }
 0x297   :  { %v186_v6 = vld [vmem:[#allocation4] sm:$0xff] }
 0x298   :  { %258 = vlog2.f32 %v186_v6 }
 0x29d   :  { %v184_v7 = vld [vmem:[#allocation5] sm:$0xff] }
 0x29e   :  { %v259_v10 = vpop.eup %258  ;;  %vm191_vm10 = vcmp.ge.f32.partialorder %v184_v7, %v185_v9 }
 0x29f   :  { %v236_v11 = vsel %vm191_vm10, 1.0, %v314_v8  ;;  %v188_v12 = vmul.f32 0.6931472, %v259_v10 }
 0x2a0   :  { %v204_v13 = vsel %vm65_vm8, %v236_v11, 0.0 }
 0x2a1   :  { %205 = vadd.xlane.f32.xlu0 %v204_v13  ;;  %v189_v14 = vadd.f32 %v188_v12, %v185_v9 }
 0x2a3   :  { %v190_v15 = vsub.f32 %v189_v14, %v184_v7 }
 0x2a5   :  { %v194_v16 = vsel %vm65_vm8, %v190_v15, 0.0 }
 0x2a6   :  { %195 = vadd.xlane.f32.xlu2 %v194_v16 }
 0x314   :  { %v206_v17 = vpop.xlane.xlu0 %205 }
 0x315   :  { %v207_v18 = vrot.slane %v206_v17, 4 }
 0x317   :  { %v208_v19 = vadd.f32 %v207_v18, %v206_v17 }
 0x319   :  { %v209_v20 = vrot.slane %v208_v19, 2  ;;  %v196_v21 = vpop.xlane.xlu2 %195 }
 0x31a   :  { %v197_v22 = vrot.slane %v196_v21, 4 }
 0x31b   :  { %v210_v24 = vadd.f32 %v209_v20, %v208_v19 }
 0x31c   :  { %v198_v23 = vadd.f32 %v197_v22, %v196_v21 }
 0x31d   :  { %v211_v8 = vrot.slane %v210_v24, 1 }
 0x31e   :  { %v199_v25 = vrot.slane %v198_v23, 2 }
 0x31f   :  { %v212_v29 = vadd.f32 %v211_v8, %v210_v24 }
 0x320   :  { %v200_v26 = vadd.f32 %v199_v25, %v198_v23 }
 0x322   :  { %v201_v27 = vrot.slane %v200_v26, 1 }
 0x324   :  { %v202_v28 = vadd.f32 %v201_v27, %v200_v26 }
 0x326   :  { %239 = vpush %v202_v28 }
 0x327   :  { %241 = vpush %v212_v29 }
 0x357   :  { %s240_s25 = spop %239 }
 0x358   :  { %v221_v31 = vstv %s240_s25  ;;  %s242_s26 = spop %241 }
 0x359   :  { %v219_v33 = vstv %s242_s26 }
 0x35a   :  { %v220_v34 = vsel %vm218_vm12, %v219_v33, %v93_v32 }
 0x35b   :  { %v222_v35 = vsel %vm217_vm13, %v221_v31, %v220_v34 }
 0x35c   :  { %223 = vst [vmem:[%s377_s2] sm:$0xff] %v222_v35 }
 0x35d   :  { %232 = vsyncpa [#allocation7], 1 }
 0x35e   :  { %233 = vsyncpa [#allocation9], 1 }

</bundles_post_ra>
